<compile_context>
chip_gen: v7x
topology: tpu7x:2x2x1
jax: 0.10.0
libtpu: 0.0.40
codegen_flags: <defaults>
</compile_context>

<pallas_src>
import functools

import jax
import jax.numpy as jnp
from jax.experimental import pallas as pl
from jax.experimental.pallas import tpu as pltpu

LANE = 128
SUB = 8  # f32 sublane width (x stays f32 at the pallas_call boundary)


def _round_up(n: int, m: int) -> int:
    return ((n + m - 1) // m) * m


def _pad2(a, rows: int, cols: int, dtype):
    """Zero-pad a 2-D array to (rows, cols) and cast to dtype."""
    out = jnp.zeros((rows, cols), dtype)
    return out.at[: a.shape[0], : a.shape[1]].set(a.astype(dtype))


def _simplenet_kernel(x_ref, w1_ref, b1_ref, w2b_ref, b2b_ref, w3_ref, b3_ref,
                      out_ref):
    # Cast x to the MXU dtype in-kernel (no wrapper-side pad/cast pass).
    x = x_ref[...].astype(w1_ref.dtype)

    # fc1 + relu   (MXU in param dtype, f32 accumulate, f32 elementwise)
    h1 = jnp.dot(x, w1_ref[...], preferred_element_type=jnp.float32)
    h1 = jnp.maximum(h1 + b1_ref[...], 0.0)

    # fc2b + relu
    h2 = jnp.dot(h1.astype(w2b_ref.dtype), w2b_ref[...],
                 preferred_element_type=jnp.float32)
    h2 = jnp.maximum(h2 + b2b_ref[...], 0.0)

    # fc3 -> narrow (nout-wide) store, no output lane padding.
    y = jnp.dot(h2.astype(w3_ref.dtype), w3_ref[...],
                preferred_element_type=jnp.float32)
    out_ref[...] = (y + b3_ref[...]).astype(out_ref.dtype)


@functools.partial(jax.jit, static_argnames=("block_batch", "use_bf16"))
def simplenet_forward(x, params, *, block_batch: int = 2048,
                      use_bf16: bool = True):
    """x: [B, ninput] f32.  params: dict of [in, out] weights and (1, out) biases."""
    B, ninput = x.shape
    nh1 = params["w1"].shape[1]
    nh2 = params["w2b"].shape[1]
    nout = params["w3"].shape[1]

    mxu_dtype = jnp.bfloat16 if use_bf16 else jnp.float32

    # Hidden dims padded to 128 lanes (full vregs, unmasked inter-layer math).
    # Output stays at its true width; wasted MXU columns would buy nothing here.
    H1p = _round_up(nh1, LANE)
    H2p = _round_up(nh2, LANE)

    # Batch tiling: large tiles to amortize per-step overhead; on v7x cap the
    # tile so the parallel batch axis has >=2 steps (both TensorCores busy)
    # whenever the batch is large enough to split.
    Bp = _round_up(B, SUB)
    TB = _round_up(min(block_batch, Bp), SUB)
    if Bp >= 2 * SUB:
        TB = min(TB, _round_up((Bp + 1) // 2, SUB))
    Bp = _round_up(B, TB)
    grid = (Bp // TB,)

    # Pad x only along the batch dim, and only when needed (rows are zeros,
    # which stay inert and are sliced off below).
    if Bp != B:
        x_in = jnp.zeros((Bp, ninput), x.dtype).at[:B].set(x)
    else:
        x_in = x

    # Zero-padded weights (zeros stay inert through bias=0 and ReLU).
    w1 = _pad2(params["w1"], ninput, H1p, mxu_dtype)      # K dim kept unpadded
    b1 = _pad2(params["b1"], 1, H1p, jnp.float32)
    w2b = _pad2(params["w2b"], H1p, H2p, mxu_dtype)
    b2b = _pad2(params["b2b"], 1, H2p, jnp.float32)
    w3 = _pad2(params["w3"], H2p, nout, mxu_dtype)        # N dim kept unpadded
    b3 = params["b3"].astype(jnp.float32)

    flops = 2 * Bp * (ninput * H1p + H1p * H2p + H2p * nout)
    bytes_accessed = sum(int(a.size) * a.dtype.itemsize
                         for a in (x_in, w1, b1, w2b, b2b, w3, b3))
    bytes_accessed += Bp * nout * 4  # output

    out = pl.pallas_call(
        _simplenet_kernel,
        out_shape=jax.ShapeDtypeStruct((Bp, nout), jnp.float32),
        grid=grid,
        in_specs=[
            pl.BlockSpec((TB, ninput), lambda i: (i, 0)),   # x: tiled over batch
            pl.BlockSpec((ninput, H1p), lambda i: (0, 0)),  # weights/biases stay
            pl.BlockSpec((1, H1p), lambda i: (0, 0)),       # VMEM-resident across
            pl.BlockSpec((H1p, H2p), lambda i: (0, 0)),     # all grid steps
            pl.BlockSpec((1, H2p), lambda i: (0, 0)),
            pl.BlockSpec((H2p, nout), lambda i: (0, 0)),
            pl.BlockSpec((1, nout), lambda i: (0, 0)),
        ],
        out_specs=pl.BlockSpec((TB, nout), lambda i: (i, 0)),
        compiler_params=pltpu.CompilerParams(
            dimension_semantics=("parallel",),      # shards batch across TCs on v7x
            vmem_limit_bytes=32 * 1024 * 1024,      # headroom on 64 MiB v7x VMEM
        ),
        cost_estimate=pl.CostEstimate(
            flops=flops, transcendentals=0, bytes_accessed=bytes_accessed),
    )(x_in, w1, b1, w2b, b2b, w3, b3)

    # Slice away batch padding only if it was added (no-op pass otherwise).
    if Bp != B:
        out = out[:B]
    return out


def init_params(key, ninput, noutput, nhidden1, nhidden2):
    """Deterministic synthetic parameters (shapes match SimpleNet.__init__)."""
    ks = jax.random.split(key, 8)
    # Stored as [in, out] (transpose of torch's [out, in]) for the kernel.
    w1 = jax.random.normal(ks[0], (ninput, nhidden1), jnp.float32) * 0.1
    b1 = jax.random.normal(ks[1], (1, nhidden1), jnp.float32) * 0.1
    w2b = jax.random.normal(ks[2], (nhidden1, nhidden2), jnp.float32) * 0.1
    b2b = jax.random.normal(ks[3], (1, nhidden2), jnp.float32) * 0.1
    w3 = jax.random.normal(ks[4], (nhidden2, noutput), jnp.float32) * 0.1
    b3 = jax.random.normal(ks[5], (1, noutput), jnp.float32) * 0.1
    # NOTE: fc2 (nhidden1 -> noutput) exists in the module but is unused in
    # forward(); it has no effect on the output so it is omitted.
    return {"w1": w1, "b1": b1, "w2b": w2b, "b2b": b2b, "w3": w3, "b3": b3}


def simplenet_ref(x, p):
    """Pure-JAX f32 reference for correctness checks."""
    h1 = jnp.maximum(x @ p["w1"] + p["b1"], 0.0)
    h2 = jnp.maximum(h1 @ p["w2b"] + p["b2b"], 0.0)
    return h2 @ p["w3"] + p["b3"]


if __name__ == "__main__":
    # Shapes implied by the module: prediction() reshapes to (-1, 6) -> ninput=6.
    ninput, noutput, nhidden1, nhidden2 = 6, 4, 32, 32
    batch = 8

    key = jax.random.PRNGKey(0)
    kx, kp = jax.random.split(key)
    x = jax.random.normal(kx, (batch, ninput), jnp.float32)
    params = init_params(kp, ninput, noutput, nhidden1, nhidden2)

    y_ref = simplenet_ref(x, params)

    # f32 path: exact structural check against the reference.
    y_f32 = jax.block_until_ready(simplenet_forward(x, params, use_bf16=False))
    assert y_f32.shape == (batch, noutput)
    assert jnp.allclose(y_f32, y_ref, atol=1e-5, rtol=1e-5), "f32 mismatch"

    # bf16 MXU fast path (default): loose tolerance vs. f32 reference.
    y_bf16 = jax.block_until_ready(simplenet_forward(x, params, use_bf16=True))
    assert y_bf16.shape == (batch, noutput)
    assert jnp.allclose(y_bf16, y_ref, atol=3e-2, rtol=3e-2), "bf16 mismatch"

    # Non-divisible batch + >1 grid step exercise (batch padding / row slice).
    xb = jax.random.normal(kx, (37, ninput), jnp.float32)
    yb = jax.block_until_ready(
        simplenet_forward(xb, params, block_batch=16, use_bf16=False))
    assert yb.shape == (37, noutput)
    assert jnp.allclose(yb, simplenet_ref(xb, params), atol=1e-5, rtol=1e-5)

    print("KERNEL_OK")
</pallas_src>

<mosaic_0001>
module attributes {stable_mosaic.version = 11 : i64} {
  func.func @_simplenet_kernel(%arg0: i32, %arg1: memref<8x6xf32, #tpu.memory_space<vmem>>, %arg2: memref<6x128xf32, #tpu.memory_space<vmem>>, %arg3: memref<1x128xf32, #tpu.memory_space<vmem>>, %arg4: memref<128x128xf32, #tpu.memory_space<vmem>>, %arg5: memref<1x128xf32, #tpu.memory_space<vmem>>, %arg6: memref<128x4xf32, #tpu.memory_space<vmem>>, %arg7: memref<1x4xf32, #tpu.memory_space<vmem>>, %arg8: memref<8x4xf32, #tpu.memory_space<vmem>>) attributes {dimension_semantics = [#tpu.dimension_semantics<parallel>], iteration_bounds = array<i64: 1>, scalar_prefetch = 0 : i64, scratch_operands = 0 : i64, tpu.core_type = #tpu.core_type<tc>, window_params = [{transform_indices = @transform_0, window_bounds = array<i64: 8, 6>}, {pipeline_mode = #tpu.pipeline_mode<synchronous>, transform_indices = @transform_1, window_bounds = array<i64: 6, 128>}, {pipeline_mode = #tpu.pipeline_mode<synchronous>, transform_indices = @transform_2, window_bounds = array<i64: 1, 128>}, {pipeline_mode = #tpu.pipeline_mode<synchronous>, transform_indices = @transform_3, window_bounds = array<i64: 128, 128>}, {pipeline_mode = #tpu.pipeline_mode<synchronous>, transform_indices = @transform_4, window_bounds = array<i64: 1, 128>}, {pipeline_mode = #tpu.pipeline_mode<synchronous>, transform_indices = @transform_5, window_bounds = array<i64: 128, 4>}, {pipeline_mode = #tpu.pipeline_mode<synchronous>, transform_indices = @transform_6, window_bounds = array<i64: 1, 4>}, {transform_indices = @transform_7, window_bounds = array<i64: 8, 4>}]} {
    %c0 = arith.constant 0 : index
    %c0_0 = arith.constant 0 : index
    %0 = vector.load %arg1[%c0, %c0_0] : memref<8x6xf32, #tpu.memory_space<vmem>>, vector<8x6xf32>
    %c0_1 = arith.constant 0 : index
    %c0_2 = arith.constant 0 : index
    %1 = vector.load %arg2[%c0_1, %c0_2] : memref<6x128xf32, #tpu.memory_space<vmem>>, vector<6x128xf32>
    %cst = arith.constant dense<0.000000e+00> : vector<8x128xf32>
    %2 = tpu.matmul %0, %1, %cst {dimension_numbers = #tpu.dot_dimension_numbers<[1], [0], [0], [1], [0, 0, 1, 1], [], []>} : vector<8x6xf32>, vector<6x128xf32>, vector<8x128xf32> -> vector<8x128xf32>
    %c0_3 = arith.constant 0 : index
    %c0_4 = arith.constant 0 : index
    %3 = vector.load %arg3[%c0_3, %c0_4] : memref<1x128xf32, #tpu.memory_space<vmem>>, vector<1x128xf32>
    %4 = vector.broadcast %3 : vector<1x128xf32> to vector<8x128xf32>
    %5 = arith.addf %2, %4 : vector<8x128xf32>
    %cst_5 = arith.constant 0.000000e+00 : f32
    %6 = vector.broadcast %cst_5 : f32 to vector<8x128xf32>
    %7 = arith.maximumf %5, %6 : vector<8x128xf32>
    %c0_6 = arith.constant 0 : index
    %c0_7 = arith.constant 0 : index
    %8 = vector.load %arg4[%c0_6, %c0_7] : memref<128x128xf32, #tpu.memory_space<vmem>>, vector<128x128xf32>
    %cst_8 = arith.constant dense<0.000000e+00> : vector<8x128xf32>
    %9 = tpu.matmul %7, %8, %cst_8 {dimension_numbers = #tpu.dot_dimension_numbers<[1], [0], [0], [1], [0, 0, 1, 1], [], []>} : vector<8x128xf32>, vector<128x128xf32>, vector<8x128xf32> -> vector<8x128xf32>
    %c0_9 = arith.constant 0 : index
    %c0_10 = arith.constant 0 : index
    %10 = vector.load %arg5[%c0_9, %c0_10] : memref<1x128xf32, #tpu.memory_space<vmem>>, vector<1x128xf32>
    %11 = vector.broadcast %10 : vector<1x128xf32> to vector<8x128xf32>
    %12 = arith.addf %9, %11 : vector<8x128xf32>
    %cst_11 = arith.constant 0.000000e+00 : f32
    %13 = vector.broadcast %cst_11 : f32 to vector<8x128xf32>
    %14 = arith.maximumf %12, %13 : vector<8x128xf32>
    %c0_12 = arith.constant 0 : index
    %c0_13 = arith.constant 0 : index
    %15 = vector.load %arg6[%c0_12, %c0_13] : memref<128x4xf32, #tpu.memory_space<vmem>>, vector<128x4xf32>
    %cst_14 = arith.constant dense<0.000000e+00> : vector<8x4xf32>
    %16 = tpu.matmul %14, %15, %cst_14 {dimension_numbers = #tpu.dot_dimension_numbers<[1], [0], [0], [1], [0, 0, 1, 1], [], []>} : vector<8x128xf32>, vector<128x4xf32>, vector<8x4xf32> -> vector<8x4xf32>
    %c0_15 = arith.constant 0 : index
    %c0_16 = arith.constant 0 : index
    %17 = vector.load %arg7[%c0_15, %c0_16] : memref<1x4xf32, #tpu.memory_space<vmem>>, vector<1x4xf32>
    %18 = vector.broadcast %17 : vector<1x4xf32> to vector<8x4xf32>
    %19 = arith.addf %16, %18 : vector<8x4xf32>
    %c0_17 = arith.constant 0 : index
    %c0_18 = arith.constant 0 : index
    %20 = vector.load %arg8[%c0_17, %c0_18] : memref<8x4xf32, #tpu.memory_space<vmem>>, vector<8x4xf32>
    tpu.vector_store %arg8[%c0_17, %c0_18], %19 {strides = array<i32>} : memref<8x4xf32, #tpu.memory_space<vmem>>, vector<8x4xf32>,
    return
  }
  func.func @transform_0(%arg0: i32) -> (i32, i32) {
    %c0_i32 = arith.constant 0 : i32
    %c0_i32_0 = arith.constant 0 : i32
    return %arg0, %c0_i32 : i32, i32
  }
  func.func @transform_1(%arg0: i32) -> (i32, i32) {
    %c0_i32 = arith.constant 0 : i32
    %c0_i32_0 = arith.constant 0 : i32
    %c0_i32_1 = arith.constant 0 : i32
    return %c0_i32, %c0_i32_0 : i32, i32
  }
  func.func @transform_2(%arg0: i32) -> (i32, i32) {
    %c0_i32 = arith.constant 0 : i32
    %c0_i32_0 = arith.constant 0 : i32
    %c0_i32_1 = arith.constant 0 : i32
    return %c0_i32, %c0_i32_0 : i32, i32
  }
  func.func @transform_3(%arg0: i32) -> (i32, i32) {
    %c0_i32 = arith.constant 0 : i32
    %c0_i32_0 = arith.constant 0 : i32
    %c0_i32_1 = arith.constant 0 : i32
    return %c0_i32, %c0_i32_0 : i32, i32
  }
  func.func @transform_4(%arg0: i32) -> (i32, i32) {
    %c0_i32 = arith.constant 0 : i32
    %c0_i32_0 = arith.constant 0 : i32
    %c0_i32_1 = arith.constant 0 : i32
    return %c0_i32, %c0_i32_0 : i32, i32
  }
  func.func @transform_5(%arg0: i32) -> (i32, i32) {
    %c0_i32 = arith.constant 0 : i32
    %c0_i32_0 = arith.constant 0 : i32
    %c0_i32_1 = arith.constant 0 : i32
    return %c0_i32, %c0_i32_0 : i32, i32
  }
  func.func @transform_6(%arg0: i32) -> (i32, i32) {
    %c0_i32 = arith.constant 0 : i32
    %c0_i32_0 = arith.constant 0 : i32
    %c0_i32_1 = arith.constant 0 : i32
    return %c0_i32, %c0_i32_0 : i32, i32
  }
  func.func @transform_7(%arg0: i32) -> (i32, i32) {
    %c0_i32 = arith.constant 0 : i32
    %c0_i32_0 = arith.constant 0 : i32
    return %arg0, %c0_i32 : i32, i32
  }
}

</mosaic_0001>

<bundles_post_ra>
// kernel: simplenet_forward.1
= control target key start
LH: loop header
LB: loop body
LE: loop exit
PB: predicated region body
PF: predicated region fallthrough
CT: control target
= control target key end

     0   :  { %vm39_vm0 = vcmask 1045504   ;;  %vm35_vm1 = vcmask 48128   ;;  %v474_v0 = vmov 0.0   ;;  %vm475_vm2 = vmmov 0   ;;  %s647_s1 = inlined_call_operand.vmem [shape: f32[6,128], index: 1, kind: input, shape index: {}]   ;;  %s648_s0 = inlined_call_operand.vmem [shape: f32[8,6], index: 0, kind: input, shape index: {}]   ;;  %s649_s3 = inlined_call_operand.vmem [shape: f32[128,128], index: 3, kind: input, shape index: {}]   ;;  %s650_s5 = inlined_call_operand.vmem [shape: f32[128,4], index: 5, kind: input, shape index: {}]   ;;  %s651_s2 = inlined_call_operand.vmem [shape: f32[1,128], index: 2, kind: input, shape index: {}]   ;;  %s652_s4 = inlined_call_operand.vmem [shape: f32[1,128], index: 4, kind: input, shape index: {}]   ;;  %s653_s6 = inlined_call_operand.vmem [shape: f32[1,4], index: 6, kind: input, shape index: {}]   ;;  %s654_s7 = inlined_call_operand.vmem [shape: f32[8,4], index: 7, kind: output, shape index: {}]  }
   0x1   :  { %348 = vmatprep.subr.mxu0 %v474_v0  ;;  %v27_v1 = vld [vmem:[%s647_s1] sm:$0x3f]  ;;  %350 = vmatprep.mubr.msk.f32.mxu0 %vm475_vm2, %v474_v0  ;;  %v476_v4 = vmov 0.0|0.0   ;;  %v115_v5 = vld [vmem:[%s649_s3 + $0x8] sm:$0xff]  ;;  %v116_v6 = vld [vmem:[%s649_s3 + $0x10] sm:$0xff]  ;;  %vm301_vm3 = vcmask 31744  }
   0x2   :  { %v26_v2 = vld [vmem:[%s648_s0] sm:$0xff]  ;;  %349 = vmatpush3.msk.msra.mxu0 %vm39_vm0, %v27_v1  ;;  %423 = vmatprep.subr.bf16.mxu1 %v476_v4  ;;  %v117_v7 = vld [vmem:[%s649_s3 + $0x18] sm:$0xff]  ;;  %v119_v11 = vld [vmem:[%s649_s3 + $0x28] sm:$0xff] }
   0x3   :  { %v114_v3 = vld [vmem:[%s649_s3] sm:$0xff]  ;;  %351 = vmatmul.mubr.msk.f32.vlgmr.msra.gmra.mrb[0].mxu0 %vm35_vm1, %v26_v2  ;;  %385 = vmatprep.mubr.msk.f32.mxu1 %vm475_vm2, %v474_v0  ;;  %v427_v9 = vpack.c.bf16 %v117_v7, %v116_v6  ;;  %v120_v13 = vld [vmem:[%s649_s3 + $0x30] sm:$0xff]  ;;  %v121_v14 = vld [vmem:[%s649_s3 + $0x38] sm:$0xff] }
   0x4   :  { %v424_v8 = vpack.c.bf16 %v115_v5, %v114_v3  ;;  %447 = vmatprep.subr.bf16.mxu0 %v476_v4  ;;  %420 = vmatprep.mubr.msk.f32.mxu0 %vm475_vm2, %v474_v0  ;;  %v118_v10 = vld [vmem:[%s649_s3 + $0x20] sm:$0xff]  ;;  %v433_v15 = vpack.c.bf16 %v121_v14, %v120_v13  ;;  %v123_v17 = vld [vmem:[%s649_s3 + $0x48] sm:$0xff]  ;;  %v124_v19 = vld [vmem:[%s649_s3 + $0x50] sm:$0xff] }
   0x5   :  { %v430_v12 = vpack.c.bf16 %v119_v11, %v118_v10  ;;  %v122_v16 = vld [vmem:[%s649_s3 + $0x40] sm:$0xff]  ;;  %v125_v20 = vld [vmem:[%s649_s3 + $0x58] sm:$0xff]  ;;  %v127_v23 = vld [vmem:[%s649_s3 + $0x68] sm:$0xff] }
   0x6   :  { %425 = vmatpush3.bf16.msra.mxu1 %v424_v8  ;;  %v436_v18 = vpack.c.bf16 %v123_v17, %v122_v16  ;;  %v439_v21 = vpack.c.bf16 %v125_v20, %v124_v19  ;;  %v126_v22 = vld [vmem:[%s649_s3 + $0x60] sm:$0xff]  ;;  %v128_v25 = vld [vmem:[%s649_s3 + $0x70] sm:$0xff]  ;;  %v129_v26 = vld [vmem:[%s649_s3 + $0x78] sm:$0xff] }
   0x7   :  { %426 = vmatprep.subr.bf16.mxu1 %v476_v4  ;;  %v442_v24 = vpack.c.bf16 %v127_v23, %v126_v22  ;;  %v445_v27 = vpack.c.bf16 %v129_v26, %v128_v25  ;;  %v208_v28 = vld [vmem:[%s650_s5] sm:$0xff]  ;;  %v209_v29 = vld [vmem:[%s650_s5 + $0x8] sm:$0xff]  ;;  %v210_v30 = vld [vmem:[%s650_s5 + $0x10] sm:$0xff] }
   0x8   :  { %v448_v31 = vpack.c.bf16 %v209_v29, %v208_v28  ;;  %v211_v32 = vld [vmem:[%s650_s5 + $0x18] sm:$0xff]  ;;  %v212_v34 = vld [vmem:[%s650_s5 + $0x20] sm:$0xff]  ;;  %v213_v35 = vld [vmem:[%s650_s5 + $0x28] sm:$0xff] }
   0x9   :  { %v451_v33 = vpack.c.bf16 %v211_v32, %v210_v30  ;;  %v454_v36 = vpack.c.bf16 %v213_v35, %v212_v34  ;;  %v214_v37 = vld [vmem:[%s650_s5 + $0x30] sm:$0xff]  ;;  %v215_v38 = vld [vmem:[%s650_s5 + $0x38] sm:$0xff]  ;;  %v216_v40 = vld [vmem:[%s650_s5 + $0x40] sm:$0xff] }
   0xa   :  { %428 = vmatpush3.bf16.msra.mxu1 %v427_v9  ;;  %449 = vmatpush3.bf16.msra.mxu0 %v448_v31  ;;  %v457_v39 = vpack.c.bf16 %v215_v38, %v214_v37  ;;  %v217_v41 = vld [vmem:[%s650_s5 + $0x48] sm:$0xff]  ;;  %v218_v43 = vld [vmem:[%s650_s5 + $0x50] sm:$0xff]  ;;  %v219_v44 = vld [vmem:[%s650_s5 + $0x58] sm:$0xff] }
   0xb   :  { %429 = vmatprep.subr.bf16.mxu1 %v476_v4  ;;  %450 = vmatprep.subr.bf16.mxu0 %v476_v4  ;;  %v460_v42 = vpack.c.bf16 %v217_v41, %v216_v40  ;;  %v463_v45 = vpack.c.bf16 %v219_v44, %v218_v43  ;;  %v220_v46 = vld [vmem:[%s650_s5 + $0x60] sm:$0xff]  ;;  %v221_v47 = vld [vmem:[%s650_s5 + $0x68] sm:$0xff]  ;;  %v222_v54 = vld [vmem:[%s650_s5 + $0x70] sm:$0xff] }
   0xc   :  { %v466_v48 = vpack.c.bf16 %v221_v47, %v220_v46  ;;  %v307_v49 = vld [vmem:[%s651_s2] ss:$0 sm:$0xff]  ;;  %v223_v55 = vld [vmem:[%s650_s5 + $0x78] sm:$0xff] }
   0xd   :  { %v469_v56 = vpack.c.bf16 %v223_v55, %v222_v54  ;;  %v310_v57 = vld [vmem:[%s652_s4] ss:$0 sm:$0xff] }
   0xe   :  { %431 = vmatpush3.bf16.msra.mxu1 %v430_v12  ;;  %452 = vmatpush3.bf16.msra.mxu0 %v451_v33  ;;  %v311_v62 = vld [vmem:[%s653_s6] ss:$0 sm:$0xff] }
   0xf   :  { %432 = vmatprep.subr.bf16.mxu1 %v476_v4  ;;  %453 = vmatprep.subr.bf16.mxu0 %v476_v4 }
  0x12   :  { %434 = vmatpush3.bf16.msra.mxu1 %v433_v15  ;;  %455 = vmatpush3.bf16.msra.mxu0 %v454_v36 }
  0x13   :  { %435 = vmatprep.subr.bf16.mxu1 %v476_v4  ;;  %456 = vmatprep.subr.bf16.mxu0 %v476_v4 }
  0x16   :  { %437 = vmatpush3.bf16.msra.mxu1 %v436_v18  ;;  %458 = vmatpush3.bf16.msra.mxu0 %v457_v39 }
  0x17   :  { %438 = vmatprep.subr.bf16.mxu1 %v476_v4  ;;  %459 = vmatprep.subr.bf16.mxu0 %v476_v4 }
  0x1a   :  { %440 = vmatpush3.bf16.msra.mxu1 %v439_v21  ;;  %461 = vmatpush3.bf16.msra.mxu0 %v460_v42 }
  0x1b   :  { %441 = vmatprep.subr.bf16.mxu1 %v476_v4  ;;  %462 = vmatprep.subr.bf16.mxu0 %v476_v4 }
  0x1e   :  { %443 = vmatpush3.bf16.msra.mxu1 %v442_v24  ;;  %464 = vmatpush3.bf16.msra.mxu0 %v463_v45 }
  0x1f   :  { %444 = vmatprep.subr.bf16.mxu1 %v476_v4  ;;  %465 = vmatprep.subr.bf16.mxu0 %v476_v4 }
  0x22   :  { %446 = vmatpush3.bf16.msra.mxu1 %v445_v27  ;;  %467 = vmatpush3.bf16.msra.mxu0 %v466_v48 }
  0x23   :  { %468 = vmatprep.subr.bf16.mxu0 %v476_v4 }
  0x26   :  { %470 = vmatpush3.bf16.msra.mxu0 %v469_v56 }
  0xd6   :  { %v109_v50 = vpop.f32.mrb[0].mxu0 }
  0xd7   :  { %v110_v51 = vadd.f32 %v307_v49, %v109_v50  ;;  %v352_v52 = vpop.f32.mrb[1].mxu0 }
  0xd9   :  { %v113_v53 = vmax.f32 %v110_v51, 0.0 }
  0xdb   :  { %386 = vmatmul.mubr.f32.vlgmr.msra.gmra.mrb[0].mxu1 %v113_v53 }
 0x1ae   :  { %v203_v58 = vpop.f32.mrb[0].mxu1 }
 0x1af   :  { %v204_v59 = vadd.f32 %v310_v57, %v203_v58  ;;  %v387_v60 = vpop.f32.mrb[1].mxu1 }
 0x1b1   :  { %v207_v61 = vmax.f32 %v204_v59, 0.0 }
 0x1b3   :  { %421 = vmatmul.mubr.f32.vlgmr.msra.gmra.mrb[2].mxu0 %v207_v61 }
 0x286   :  { %v297_v63 = vpop.f32.mrb[2].mxu0 }
 0x287   :  { %v298_v0 = vadd.f32 %v311_v62, %v297_v63  ;;  %v422_v1 = vpop.f32.mrb[3].mxu0 }
 0x289   :  { %302 = vst.msk [vmem:[%s654_s7] sm:$0xff] %vm301_vm3, %v298_v0 }

</bundles_post_ra>
